<compile_context>
chip_gen: v7x
topology: tpu7x:2x2x1
jax: 0.10.0
libtpu: 0.0.40
codegen_flags: <defaults>
</compile_context>

<pallas_src>
import functools

import numpy as np
import jax
import jax.numpy as jnp
from jax import lax
from jax.experimental import pallas as pl
from jax.experimental.pallas import tpu as pltpu


# --------------------------------------------------------------------------------
# Fused kernel: loss_ce, class_error, cardinality_error, loss_bbox, loss_giou
# --------------------------------------------------------------------------------
def _set_criterion_kernel(num_classes, eos_coef, inv_num_boxes, inv_batch, has_matches,
                          logits_ref, tclass_ref, mm_ref, boxes_ref,
                          ce_ref, cerr_ref, card_ref, bbox_ref, giou_ref,
                          wnll_acc, w_acc, corr_acc, card_acc, tlen_acc):
    i = pl.program_id(0)
    last = pl.num_programs(0) - 1

    # ---- step 0: init accumulators + box losses (boxes block is resident) ----
    @pl.when(i == 0)
    def _init():
        for acc in (wnll_acc, w_acc, corr_acc, card_acc, tlen_acc):
            acc[...] = jnp.zeros_like(acc)
        ce_ref[0] = 0.0
        cerr_ref[0] = 0.0
        card_ref[0] = 0.0

        bx = boxes_ref[...]                              # [8, NPAD] lane-dense, f32
        src = bx[0:4, :]
        tgt = bx[4:8, :]
        bbox_ref[0] = jnp.sum(jnp.abs(src - tgt)) * inv_num_boxes

        scx, scy, sw, sh = bx[0:1, :], bx[1:2, :], bx[2:3, :], bx[3:4, :]
        tcx, tcy, tw, th = bx[4:5, :], bx[5:6, :], bx[6:7, :], bx[7:8, :]
        sx0, sy0 = scx - 0.5 * sw, scy - 0.5 * sh
        sx1, sy1 = scx + 0.5 * sw, scy + 0.5 * sh
        tx0, ty0 = tcx - 0.5 * tw, tcy - 0.5 * th
        tx1, ty1 = tcx + 0.5 * tw, tcy + 0.5 * th
        area_s = (sx1 - sx0) * (sy1 - sy0)
        area_t = (tx1 - tx0) * (ty1 - ty0)
        iw = jnp.maximum(jnp.minimum(sx1, tx1) - jnp.maximum(sx0, tx0), 0.0)
        ih = jnp.maximum(jnp.minimum(sy1, ty1) - jnp.maximum(sy0, ty0), 0.0)
        inter = iw * ih
        union = area_s + area_t - inter
        iou = inter / union                              # valid boxes (as in torch path)
        area_c = ((jnp.maximum(sx1, tx1) - jnp.minimum(sx0, tx0)) *
                  (jnp.maximum(sy1, ty1) - jnp.minimum(sy0, ty0)))
        giou = iou - (area_c - union) / area_c           # diag(generalized_box_iou)
        giou_ref[0] = jnp.sum(1.0 - giou) * inv_num_boxes

    # ---- classification: per-batch partial sums over this query tile ----
    logits = logits_ref[...].astype(jnp.float32)         # [B, TQ, C1]
    tcls = tclass_ref[...]                               # [B, TQ] int32
    mm = mm_ref[...]                                     # [B, TQ] f32 (1 = matched)
    Bq, TQ, C1 = logits.shape

    iota_c = lax.broadcasted_iota(jnp.int32, (Bq, TQ, C1), 2)
    tsel = iota_c == tcls[:, :, None]

    m = jnp.max(logits, axis=-1, keepdims=True)          # [B, TQ, 1]
    m2 = m[..., 0]                                       # [B, TQ]
    lse = m2 + jnp.log(jnp.sum(jnp.exp(logits - m), axis=-1))
    picked = jnp.sum(jnp.where(tsel, logits, 0.0), axis=-1)   # logit of target class
    nll = lse - picked                                   # [B, TQ]

    # CE weight read straight off the label (no weight table, no onehot materialized)
    w_t = jnp.where(tcls == num_classes, eos_coef, 1.0)
    wnll_acc[...] = wnll_acc[...] + jnp.sum(w_t * nll, axis=1, keepdims=True)
    w_acc[...] = w_acc[...] + jnp.sum(w_t, axis=1, keepdims=True)

    # top-1 correctness without a second argmax reduction: target attains the max
    # (exact logit ties are measure-zero for float network outputs)
    correct = jnp.where(picked == m2, mm, 0.0)
    corr_acc[...] = corr_acc[...] + jnp.sum(correct, axis=1, keepdims=True)
    tlen_acc[...] = tlen_acc[...] + jnp.sum(mm, axis=1, keepdims=True)

    # cardinality: argmax != no-object  <=>  the no-object logit is not the max
    no_obj = logits[:, :, num_classes:num_classes + 1]   # [B, TQ, 1]
    not_empty = jnp.where(no_obj < m, 1.0, 0.0)
    card_acc[...] = card_acc[...] + jnp.sum(not_empty, axis=1)      # [B, 1]

    # ---- last step: finalize scalar outputs ----
    @pl.when(i == last)
    def _fin():
        ce_ref[0] = jnp.sum(wnll_acc[...]) / jnp.sum(w_acc[...])
        if has_matches:                                  # static python bool
            cerr_ref[0] = 100.0 - 100.0 * (jnp.sum(corr_acc[...]) /
                                           jnp.sum(tlen_acc[...]))
        else:
            cerr_ref[0] = 100.0                          # torch: accuracy([]) -> 0
        card_ref[0] = jnp.sum(jnp.abs(card_acc[...] - tlen_acc[...])) * inv_batch


# --------------------------------------------------------------------------------
# Wrapper
# --------------------------------------------------------------------------------
def _pick_query_tile(Q):
    """Tile the query axis only for large Q; a tile must be a multiple of 128
    because Q is the lane dim of the [B, Q] label/mask inputs."""
    if Q > 512 and Q % 128 == 0:
        for tq in (512, 256, 128):
            if Q % tq == 0:
                return tq
    return Q


def set_criterion_forward(outputs, targets, num_classes, eos_coef):
    """JAX/Pallas equivalent of SetCriterion.forward with losses
    ['labels', 'cardinality', 'boxes'] and no aux_outputs."""
    pred_logits = outputs['pred_logits']                 # [B, Q, num_classes+1]
    pred_boxes = outputs['pred_boxes']                   # [B, Q, 4]
    B, Q, C1 = pred_logits.shape

    # TODO(synk): Hungarian matching (scipy linear_sum_assignment) has no clean Pallas
    # equivalent; use a deterministic identity matcher (target j <-> query j) instead.
    # TODO(synk): the per-batch gather below is trace-time glue; an in-kernel gather
    # via PrefetchScalarGridSpec indices would remove these remaining XLA ops.

    # target_classes (fill value 0, exactly as the reference code does), matched mask,
    # and the matched (src, tgt) box pairs.
    tc_rows, mm_rows, src_list, tgt_list = [], [], [], []
    for b, t in enumerate(targets):
        n = int(t['labels'].shape[0])
        tc_rows.append(jnp.concatenate(
            [t['labels'].astype(jnp.int32), jnp.zeros((Q - n,), jnp.int32)]))
        mm_rows.append(jnp.concatenate(
            [jnp.ones((n,), jnp.float32), jnp.zeros((Q - n,), jnp.float32)]))
        if n > 0:
            src_list.append(pred_boxes[b, :n].astype(jnp.float32))
            tgt_list.append(t['boxes'][:n].astype(jnp.float32))
    target_classes = jnp.stack(tc_rows)                  # [B, Q] int32
    matched_mask = jnp.stack(mm_rows)                    # [B, Q] f32

    n_match = sum(int(t['labels'].shape[0]) for t in targets)
    num_boxes = float(max(n_match, 1))                   # world_size == 1, clamp(min=1)

    # lane-dense matched boxes: rows 0..3 = src (cx,cy,w,h), rows 4..7 = tgt; pad the
    # lane axis to a multiple of 128 with identical valid dummy pairs (0 contribution).
    npad = max(128, ((n_match + 127) // 128) * 128)
    pad = jnp.tile(jnp.array([[0.5, 0.5, 0.2, 0.2]], jnp.float32),
                   (npad - n_match, 1))
    src_p = jnp.concatenate(src_list + [pad], axis=0)
    tgt_p = jnp.concatenate(tgt_list + [pad], axis=0)
    boxes = jnp.concatenate([src_p.T, tgt_p.T], axis=0)  # [8, npad]

    tq = _pick_query_tile(Q)
    grid = (Q // tq,)
    smem_out = pl.BlockSpec((1,), lambda i: (0,),
                            memory_space=pltpu.MemorySpace.SMEM)

    kernel = functools.partial(
        _set_criterion_kernel, int(num_classes), float(eos_coef),
        1.0 / num_boxes, 1.0 / float(B), n_match > 0)

    # TODO(synk): per-core partial accumulators would allow marking the query-tile
    # axis "parallel" to shard across v7x's 2 TensorCores; kept "arbitrary" here.
    ce, cerr, card, bbox, giou = pl.pallas_call(
        kernel,
        out_shape=tuple(jax.ShapeDtypeStruct((1,), jnp.float32) for _ in range(5)),
        grid_spec=pltpu.PrefetchScalarGridSpec(
            num_scalar_prefetch=0,
            grid=grid,
            in_specs=[
                # native dtype/shape (full-array last dims are exempt from (8,128))
                pl.BlockSpec((B, tq, C1), lambda i: (0, i, 0)),
                pl.BlockSpec((B, tq), lambda i: (0, i)),
                pl.BlockSpec((B, tq), lambda i: (0, i)),
                pl.BlockSpec((8, npad), lambda i: (0, 0)),
            ],
            out_specs=(smem_out,) * 5,
            scratch_shapes=[pltpu.VMEM((B, 1), jnp.float32) for _ in range(5)],
        ),
        compiler_params=pltpu.CompilerParams(
            dimension_semantics=("arbitrary",)),
    )(pred_logits, target_classes, matched_mask, boxes)

    return {'loss_ce': ce[0],
            'class_error': cerr[0],
            'cardinality_error': card[0],
            'loss_bbox': bbox[0],
            'loss_giou': giou[0]}


# --------------------------------------------------------------------------------
# Pure-JAX reference (mirrors the PyTorch math) for a correctness check
# --------------------------------------------------------------------------------
def _reference_forward(outputs, targets, num_classes, eos_coef):
    pred_logits = outputs['pred_logits'].astype(jnp.float32)
    pred_boxes = outputs['pred_boxes'].astype(jnp.float32)
    B, Q, C1 = pred_logits.shape
    empty_weight = jnp.ones((C1,), jnp.float32).at[-1].set(eos_coef)

    target_classes = jnp.zeros((B, Q), jnp.int32)
    matched_mask = jnp.zeros((B, Q), jnp.float32)
    src_list, tgt_list = [], []
    for b, t in enumerate(targets):
        n = t['labels'].shape[0]
        idx = jnp.arange(n)
        target_classes = target_classes.at[b, idx].set(t['labels'].astype(jnp.int32))
        matched_mask = matched_mask.at[b, idx].set(1.0)
        src_list.append(pred_boxes[b, idx])
        tgt_list.append(t['boxes'][idx])
    src_b = jnp.concatenate(src_list, 0)
    tgt_b = jnp.concatenate(tgt_list, 0)
    num_boxes = float(max(int(src_b.shape[0]), 1))

    logp = jax.nn.log_softmax(pred_logits, -1)
    nll = -jnp.take_along_axis(logp, target_classes[..., None], axis=-1)[..., 0]
    w_t = empty_weight[target_classes]
    loss_ce = jnp.sum(w_t * nll) / jnp.sum(w_t)

    pred = jnp.argmax(pred_logits, -1)
    acc = 100.0 * jnp.sum((pred == target_classes) * matched_mask) / jnp.sum(matched_mask)
    class_error = 100.0 - acc

    tgt_lens = jnp.array([t['labels'].shape[0] for t in targets], jnp.float32)
    card_pred = jnp.sum((pred != num_classes).astype(jnp.float32), axis=1)
    card_err = jnp.mean(jnp.abs(card_pred - tgt_lens))

    loss_bbox = jnp.sum(jnp.abs(src_b - tgt_b)) / num_boxes

    def xyxy(b):
        cx, cy, w, h = b[:, 0], b[:, 1], b[:, 2], b[:, 3]
        return cx - 0.5 * w, cy - 0.5 * h, cx + 0.5 * w, cy + 0.5 * h

    sx0, sy0, sx1, sy1 = xyxy(src_b)
    tx0, ty0, tx1, ty1 = xyxy(tgt_b)
    area_s = (sx1 - sx0) * (sy1 - sy0)
    area_t = (tx1 - tx0) * (ty1 - ty0)
    inter = (jnp.maximum(jnp.minimum(sx1, tx1) - jnp.maximum(sx0, tx0), 0.0) *
             jnp.maximum(jnp.minimum(sy1, ty1) - jnp.maximum(sy0, ty0), 0.0))
    union = area_s + area_t - inter
    iou = inter / union
    area_c = (jnp.maximum(jnp.maximum(sx1, tx1) - jnp.minimum(sx0, tx0), 0.0) *
              jnp.maximum(jnp.maximum(sy1, ty1) - jnp.minimum(sy0, ty0), 0.0))
    giou = iou - (area_c - union) / area_c
    loss_giou = jnp.sum(1.0 - giou) / num_boxes

    return {'loss_ce': loss_ce, 'class_error': class_error,
            'cardinality_error': card_err, 'loss_bbox': loss_bbox,
            'loss_giou': loss_giou}


# --------------------------------------------------------------------------------
if __name__ == "__main__":
    B, Q, num_classes = 2, 8, 4
    eos_coef = 0.1
    C1 = num_classes + 1

    key = jax.random.PRNGKey(0)
    k1, k2, k3, k4, k5, k6 = jax.random.split(key, 6)

    pred_logits = jax.random.normal(k1, (B, Q, C1), jnp.float32)
    pred_boxes = jax.nn.sigmoid(jax.random.normal(k2, (B, Q, 4), jnp.float32))

    # targets: 3 boxes in image 0, 2 boxes in image 1
    tgt_counts = [3, 2]
    lab_keys = [k3, k4]
    box_keys = [k5, k6]
    targets = []
    for n, lk, bk in zip(tgt_counts, lab_keys, box_keys):
        labels = jax.random.randint(lk, (n,), 0, num_classes)
        cxy = 0.2 + 0.6 * jax.random.uniform(bk, (n, 2), jnp.float32)
        wh = 0.05 + 0.25 * jax.random.uniform(jax.random.fold_in(bk, 1), (n, 2),
                                              jnp.float32)
        boxes = jnp.concatenate([cxy, wh], axis=-1)   # (cx, cy, w, h), valid & normalized
        targets.append({'labels': labels, 'boxes': boxes})

    outputs = {'pred_logits': pred_logits, 'pred_boxes': pred_boxes}

    losses = set_criterion_forward(outputs, targets, num_classes, eos_coef)
    losses = jax.block_until_ready(losses)

    ref = _reference_forward(outputs, targets, num_classes, eos_coef)
    for k in losses:
        np.testing.assert_allclose(np.asarray(losses[k]), np.asarray(ref[k]),
                                   rtol=1e-4, atol=1e-4)

    print("KERNEL_OK")
</pallas_src>

<mosaic_0001>
module attributes {stable_mosaic.version = 11 : i64} {
  func.func @_set_criterion_kernel(%arg0: i32, %arg1: memref<2x8x5xf32, #tpu.memory_space<vmem>>, %arg2: memref<2x8xi32, #tpu.memory_space<vmem>>, %arg3: memref<2x8xf32, #tpu.memory_space<vmem>>, %arg4: memref<8x128xf32, #tpu.memory_space<vmem>>, %arg5: memref<1xf32, #tpu.memory_space<smem>>, %arg6: memref<1xf32, #tpu.memory_space<smem>>, %arg7: memref<1xf32, #tpu.memory_space<smem>>, %arg8: memref<1xf32, #tpu.memory_space<smem>>, %arg9: memref<1xf32, #tpu.memory_space<smem>>, %arg10: memref<2x1xf32, #tpu.memory_space<vmem>>, %arg11: memref<2x1xf32, #tpu.memory_space<vmem>>, %arg12: memref<2x1xf32, #tpu.memory_space<vmem>>, %arg13: memref<2x1xf32, #tpu.memory_space<vmem>>, %arg14: memref<2x1xf32, #tpu.memory_space<vmem>>) attributes {dimension_semantics = [#tpu.dimension_semantics<arbitrary>], iteration_bounds = array<i64: 1>, scalar_prefetch = 0 : i64, scratch_operands = 5 : i64, tpu.core_type = #tpu.core_type<tc>, window_params = [{transform_indices = @transform_0, window_bounds = array<i64: 2, 8, 5>}, {transform_indices = @transform_1, window_bounds = array<i64: 2, 8>}, {transform_indices = @transform_2, window_bounds = array<i64: 2, 8>}, {pipeline_mode = #tpu.pipeline_mode<synchronous>, transform_indices = @transform_3, window_bounds = array<i64: 8, 128>}, {transform_indices = @transform_4, window_bounds = array<i64: 1>}, {transform_indices = @transform_5, window_bounds = array<i64: 1>}, {transform_indices = @transform_6, window_bounds = array<i64: 1>}, {transform_indices = @transform_7, window_bounds = array<i64: 1>}, {transform_indices = @transform_8, window_bounds = array<i64: 1>}]} {
    %c0_i32 = arith.constant 0 : i32
    %0 = arith.cmpi eq, %arg0, %c0_i32 : i32
    %1 = arith.extui %0 : i1 to i32
    %c0_i32_0 = arith.constant 0 : i32
    %2 = arith.cmpi ne, %1, %c0_i32_0 : i32
    scf.if %2 {
      %cst_42 = arith.constant 0.000000e+00 : f32
      %64 = vector.broadcast %cst_42 : f32 to vector<2x1xf32>
      %c0_43 = arith.constant 0 : index
      %c0_44 = arith.constant 0 : index
      %65 = vector.load %arg10[%c0_43, %c0_44] : memref<2x1xf32, #tpu.memory_space<vmem>>, vector<2x1xf32>
      tpu.vector_store %arg10[%c0_43, %c0_44], %64 {strides = array<i32>} : memref<2x1xf32, #tpu.memory_space<vmem>>, vector<2x1xf32>,
      %cst_45 = arith.constant 0.000000e+00 : f32
      %66 = vector.broadcast %cst_45 : f32 to vector<2x1xf32>
      %c0_46 = arith.constant 0 : index
      %c0_47 = arith.constant 0 : index
      %67 = vector.load %arg11[%c0_46, %c0_47] : memref<2x1xf32, #tpu.memory_space<vmem>>, vector<2x1xf32>
      tpu.vector_store %arg11[%c0_46, %c0_47], %66 {strides = array<i32>} : memref<2x1xf32, #tpu.memory_space<vmem>>, vector<2x1xf32>,
      %cst_48 = arith.constant 0.000000e+00 : f32
      %68 = vector.broadcast %cst_48 : f32 to vector<2x1xf32>
      %c0_49 = arith.constant 0 : index
      %c0_50 = arith.constant 0 : index
      %69 = vector.load %arg12[%c0_49, %c0_50] : memref<2x1xf32, #tpu.memory_space<vmem>>, vector<2x1xf32>
      tpu.vector_store %arg12[%c0_49, %c0_50], %68 {strides = array<i32>} : memref<2x1xf32, #tpu.memory_space<vmem>>, vector<2x1xf32>,
      %cst_51 = arith.constant 0.000000e+00 : f32
      %70 = vector.broadcast %cst_51 : f32 to vector<2x1xf32>
      %c0_52 = arith.constant 0 : index
      %c0_53 = arith.constant 0 : index
      %71 = vector.load %arg13[%c0_52, %c0_53] : memref<2x1xf32, #tpu.memory_space<vmem>>, vector<2x1xf32>
      tpu.vector_store %arg13[%c0_52, %c0_53], %70 {strides = array<i32>} : memref<2x1xf32, #tpu.memory_space<vmem>>, vector<2x1xf32>,
      %cst_54 = arith.constant 0.000000e+00 : f32
      %72 = vector.broadcast %cst_54 : f32 to vector<2x1xf32>
      %c0_55 = arith.constant 0 : index
      %c0_56 = arith.constant 0 : index
      %73 = vector.load %arg14[%c0_55, %c0_56] : memref<2x1xf32, #tpu.memory_space<vmem>>, vector<2x1xf32>
      tpu.vector_store %arg14[%c0_55, %c0_56], %72 {strides = array<i32>} : memref<2x1xf32, #tpu.memory_space<vmem>>, vector<2x1xf32>,
      %cst_57 = arith.constant 0.000000e+00 : f32
      %c0_58 = arith.constant 0 : index
      %74 = memref.load %arg5[%c0_58] : memref<1xf32, #tpu.memory_space<smem>>
      memref.store %cst_57, %arg5[%c0_58] : memref<1xf32, #tpu.memory_space<smem>>
      %cst_59 = arith.constant 0.000000e+00 : f32
      %c0_60 = arith.constant 0 : index
      %75 = memref.load %arg6[%c0_60] : memref<1xf32, #tpu.memory_space<smem>>
      memref.store %cst_59, %arg6[%c0_60] : memref<1xf32, #tpu.memory_space<smem>>
      %cst_61 = arith.constant 0.000000e+00 : f32
      %c0_62 = arith.constant 0 : index
      %76 = memref.load %arg7[%c0_62] : memref<1xf32, #tpu.memory_space<smem>>
      memref.store %cst_61, %arg7[%c0_62] : memref<1xf32, #tpu.memory_space<smem>>
      %c0_63 = arith.constant 0 : index
      %c0_64 = arith.constant 0 : index
      %77 = vector.load %arg4[%c0_63, %c0_64] : memref<8x128xf32, #tpu.memory_space<vmem>>, vector<8x128xf32>
      %78 = vector.extract_strided_slice %77 {offsets = [0, 0], sizes = [4, 128], strides = [1, 1]} : vector<8x128xf32> to vector<4x128xf32>
      %79 = vector.extract_strided_slice %77 {offsets = [4, 0], sizes = [4, 128], strides = [1, 1]} : vector<8x128xf32> to vector<4x128xf32>
      %80 = arith.subf %78, %79 : vector<4x128xf32>
      %81 = math.absf %80 : vector<4x128xf32>
      %82 = vector.shape_cast %81 : vector<4x128xf32> to vector<1x4x128xf32>
      %cst_65 = arith.constant dense<0.000000e+00> : vector<1xf32>
      %83 = vector.multi_reduction <add>, %82, %cst_65 [1, 2] : vector<1x4x128xf32> to vector<1xf32>
      %84 = vector.shape_cast %83 : vector<1xf32> to vector<1x1x1xf32>
      %85 = vector.extract %84[0, 0, 0] : f32 from vector<1x1x1xf32>
      %cst_66 = arith.constant 2.000000e-01 : f32
      %86 = arith.mulf %85, %cst_66 : f32
      %c0_67 = arith.constant 0 : index
      %87 = memref.load %arg8[%c0_67] : memref<1xf32, #tpu.memory_space<smem>>
      memref.store %86, %arg8[%c0_67] : memref<1xf32, #tpu.memory_space<smem>>
      %88 = vector.extract_strided_slice %77 {offsets = [0, 0], sizes = [1, 128], strides = [1, 1]} : vector<8x128xf32> to vector<1x128xf32>
      %89 = vector.extract_strided_slice %77 {offsets = [1, 0], sizes = [1, 128], strides = [1, 1]} : vector<8x128xf32> to vector<1x128xf32>
      %90 = vector.extract_strided_slice %77 {offsets = [2, 0], sizes = [1, 128], strides = [1, 1]} : vector<8x128xf32> to vector<1x128xf32>
      %91 = vector.extract_strided_slice %77 {offsets = [3, 0], sizes = [1, 128], strides = [1, 1]} : vector<8x128xf32> to vector<1x128xf32>
      %92 = vector.extract_strided_slice %77 {offsets = [4, 0], sizes = [1, 128], strides = [1, 1]} : vector<8x128xf32> to vector<1x128xf32>
      %93 = vector.extract_strided_slice %77 {offsets = [5, 0], sizes = [1, 128], strides = [1, 1]} : vector<8x128xf32> to vector<1x128xf32>
      %94 = vector.extract_strided_slice %77 {offsets = [6, 0], sizes = [1, 128], strides = [1, 1]} : vector<8x128xf32> to vector<1x128xf32>
      %95 = vector.extract_strided_slice %77 {offsets = [7, 0], sizes = [1, 128], strides = [1, 1]} : vector<8x128xf32> to vector<1x128xf32>
      %cst_68 = arith.constant 5.000000e-01 : f32
      %96 = vector.broadcast %cst_68 : f32 to vector<1x128xf32>
      %97 = arith.mulf %96, %90 : vector<1x128xf32>
      %98 = arith.subf %88, %97 : vector<1x128xf32>
      %cst_69 = arith.constant 5.000000e-01 : f32
      %99 = vector.broadcast %cst_69 : f32 to vector<1x128xf32>
      %100 = arith.mulf %99, %91 : vector<1x128xf32>
      %101 = arith.subf %89, %100 : vector<1x128xf32>
      %cst_70 = arith.constant 5.000000e-01 : f32
      %102 = vector.broadcast %cst_70 : f32 to vector<1x128xf32>
      %103 = arith.mulf %102, %90 : vector<1x128xf32>
      %104 = arith.addf %88, %103 : vector<1x128xf32>
      %cst_71 = arith.constant 5.000000e-01 : f32
      %105 = vector.broadcast %cst_71 : f32 to vector<1x128xf32>
      %106 = arith.mulf %105, %91 : vector<1x128xf32>
      %107 = arith.addf %89, %106 : vector<1x128xf32>
      %cst_72 = arith.constant 5.000000e-01 : f32
      %108 = vector.broadcast %cst_72 : f32 to vector<1x128xf32>
      %109 = arith.mulf %108, %94 : vector<1x128xf32>
      %110 = arith.subf %92, %109 : vector<1x128xf32>
      %cst_73 = arith.constant 5.000000e-01 : f32
      %111 = vector.broadcast %cst_73 : f32 to vector<1x128xf32>
      %112 = arith.mulf %111, %95 : vector<1x128xf32>
      %113 = arith.subf %93, %112 : vector<1x128xf32>
      %cst_74 = arith.constant 5.000000e-01 : f32
      %114 = vector.broadcast %cst_74 : f32 to vector<1x128xf32>
      %115 = arith.mulf %114, %94 : vector<1x128xf32>
      %116 = arith.addf %92, %115 : vector<1x128xf32>
      %cst_75 = arith.constant 5.000000e-01 : f32
      %117 = vector.broadcast %cst_75 : f32 to vector<1x128xf32>
      %118 = arith.mulf %117, %95 : vector<1x128xf32>
      %119 = arith.addf %93, %118 : vector<1x128xf32>
      %120 = arith.subf %104, %98 : vector<1x128xf32>
      %121 = arith.subf %107, %101 : vector<1x128xf32>
      %122 = arith.mulf %120, %121 : vector<1x128xf32>
      %123 = arith.subf %116, %110 : vector<1x128xf32>
      %124 = arith.subf %119, %113 : vector<1x128xf32>
      %125 = arith.mulf %123, %124 : vector<1x128xf32>
      %126 = arith.minimumf %104, %116 : vector<1x128xf32>
      %127 = arith.maximumf %98, %110 : vector<1x128xf32>
      %128 = arith.subf %126, %127 : vector<1x128xf32>
      %cst_76 = arith.constant 0.000000e+00 : f32
      %129 = vector.broadcast %cst_76 : f32 to vector<1x128xf32>
      %130 = arith.maximumf %128, %129 : vector<1x128xf32>
      %131 = arith.minimumf %107, %119 : vector<1x128xf32>
      %132 = arith.maximumf %101, %113 : vector<1x128xf32>
      %133 = arith.subf %131, %132 : vector<1x128xf32>
      %cst_77 = arith.constant 0.000000e+00 : f32
      %134 = vector.broadcast %cst_77 : f32 to vector<1x128xf32>
      %135 = arith.maximumf %133, %134 : vector<1x128xf32>
      %136 = arith.mulf %130, %135 : vector<1x128xf32>
      %137 = arith.addf %122, %125 : vector<1x128xf32>
      %138 = arith.subf %137, %136 : vector<1x128xf32>
      %139 = arith.divf %136, %138 : vector<1x128xf32>
      %140 = arith.maximumf %104, %116 : vector<1x128xf32>
      %141 = arith.minimumf %98, %110 : vector<1x128xf32>
      %142 = arith.subf %140, %141 : vector<1x128xf32>
      %143 = arith.maximumf %107, %119 : vector<1x128xf32>
      %144 = arith.minimumf %101, %113 : vector<1x128xf32>
      %145 = arith.subf %143, %144 : vector<1x128xf32>
      %146 = arith.mulf %142, %145 : vector<1x128xf32>
      %147 = arith.subf %146, %138 : vector<1x128xf32>
      %148 = arith.divf %147, %146 : vector<1x128xf32>
      %149 = arith.subf %139, %148 : vector<1x128xf32>
      %cst_78 = arith.constant 1.000000e+00 : f32
      %150 = vector.broadcast %cst_78 : f32 to vector<1x128xf32>
      %151 = arith.subf %150, %149 : vector<1x128xf32>
      %152 = vector.shape_cast %151 : vector<1x128xf32> to vector<1x1x128xf32>
      %cst_79 = arith.constant dense<0.000000e+00> : vector<1xf32>
      %153 = vector.multi_reduction <add>, %152, %cst_79 [1, 2] : vector<1x1x128xf32> to vector<1xf32>
      %154 = vector.shape_cast %153 : vector<1xf32> to vector<1x1x1xf32>
      %155 = vector.extract %154[0, 0, 0] : f32 from vector<1x1x1xf32>
      %cst_80 = arith.constant 2.000000e-01 : f32
      %156 = arith.mulf %155, %cst_80 : f32
      %c0_81 = arith.constant 0 : index
      %157 = memref.load %arg9[%c0_81] : memref<1xf32, #tpu.memory_space<smem>>
      memref.store %156, %arg9[%c0_81] : memref<1xf32, #tpu.memory_space<smem>>
    } else {
    }
    %c0 = arith.constant 0 : index
    %c0_1 = arith.constant 0 : index
    %c0_2 = arith.constant 0 : index
    %3 = vector.load %arg1[%c0, %c0_1, %c0_2] : memref<2x8x5xf32, #tpu.memory_space<vmem>>, vector<2x8x5xf32>
    %c0_3 = arith.constant 0 : index
    %c0_4 = arith.constant 0 : index
    %4 = vector.load %arg2[%c0_3, %c0_4] : memref<2x8xi32, #tpu.memory_space<vmem>>, vector<2x8xi32>
    %c0_5 = arith.constant 0 : index
    %c0_6 = arith.constant 0 : index
    %5 = vector.load %arg3[%c0_5, %c0_6] : memref<2x8xf32, #tpu.memory_space<vmem>>, vector<2x8xf32>
    %6 = tpu.iota {dimensions = array<i32: 2>} : vector<2x8x5xi32>
    %7 = vector.shape_cast %4 : vector<2x8xi32> to vector<2x8x1xi32>
    %8 = vector.broadcast %7 : vector<2x8x1xi32> to vector<2x8x5xi32>
    %9 = arith.cmpi eq, %6, %8 : vector<2x8x5xi32>
    %cst = arith.constant dense<0xFF800000> : vector<2x8xf32>
    %10 = vector.multi_reduction <maximumf>, %3, %cst [2] : vector<2x8x5xf32> to vector<2x8xf32>
    %11 = vector.shape_cast %10 : vector<2x8xf32> to vector<2x8x1xf32>
    %12 = vector.shape_cast %11 : vector<2x8x1xf32> to vector<2x8xf32>
    %13 = vector.broadcast %11 : vector<2x8x1xf32> to vector<2x8x5xf32>
    %14 = arith.subf %3, %13 : vector<2x8x5xf32>
    %15 = math.exp %14 : vector<2x8x5xf32>
    %cst_7 = arith.constant dense<0.000000e+00> : vector<2x8xf32>
    %16 = vector.multi_reduction <add>, %15, %cst_7 [2] : vector<2x8x5xf32> to vector<2x8xf32>
    %17 = math.log %16 : vector<2x8xf32>
    %18 = arith.addf %12, %17 : vector<2x8xf32>
    %cst_8 = arith.constant 0.000000e+00 : f32
    %19 = vector.broadcast %cst_8 : f32 to vector<2x8x5xf32>
    %20 = arith.select %9, %3, %19 : vector<2x8x5xi1>, vector<2x8x5xf32>
    %cst_9 = arith.constant dense<0.000000e+00> : vector<2x8xf32>
    %21 = vector.multi_reduction <add>, %20, %cst_9 [2] : vector<2x8x5xf32> to vector<2x8xf32>
    %22 = arith.subf %18, %21 : vector<2x8xf32>
    %c4_i32 = arith.constant 4 : i32
    %23 = vector.broadcast %c4_i32 : i32 to vector<2x8xi32>
    %24 = arith.cmpi eq, %4, %23 : vector<2x8xi32>
    %cst_10 = arith.constant 1.000000e-01 : f32
    %cst_11 = arith.constant 1.000000e+00 : f32
    %25 = vector.broadcast %cst_10 : f32 to vector<2x8xf32>
    %26 = vector.broadcast %cst_11 : f32 to vector<2x8xf32>
    %27 = arith.select %24, %25, %26 : vector<2x8xi1>, vector<2x8xf32>
    %c0_12 = arith.constant 0 : index
    %c0_13 = arith.constant 0 : index
    %28 = vector.load %arg10[%c0_12, %c0_13] : memref<2x1xf32, #tpu.memory_space<vmem>>, vector<2x1xf32>
    %29 = arith.mulf %27, %22 : vector<2x8xf32>
    %cst_14 = arith.constant dense<0.000000e+00> : vector<2xf32>
    %30 = vector.multi_reduction <add>, %29, %cst_14 [1] : vector<2x8xf32> to vector<2xf32>
    %31 = vector.shape_cast %30 : vector<2xf32> to vector<2x1xf32>
    %32 = arith.addf %28, %31 : vector<2x1xf32>
    %c0_15 = arith.constant 0 : index
    %c0_16 = arith.constant 0 : index
    %33 = vector.load %arg10[%c0_15, %c0_16] : memref<2x1xf32, #tpu.memory_space<vmem>>, vector<2x1xf32>
    tpu.vector_store %arg10[%c0_15, %c0_16], %32 {strides = array<i32>} : memref<2x1xf32, #tpu.memory_space<vmem>>, vector<2x1xf32>,
    %c0_17 = arith.constant 0 : index
    %c0_18 = arith.constant 0 : index
    %34 = vector.load %arg11[%c0_17, %c0_18] : memref<2x1xf32, #tpu.memory_space<vmem>>, vector<2x1xf32>
    %cst_19 = arith.constant dense<0.000000e+00> : vector<2xf32>
    %35 = vector.multi_reduction <add>, %27, %cst_19 [1] : vector<2x8xf32> to vector<2xf32>
    %36 = vector.shape_cast %35 : vector<2xf32> to vector<2x1xf32>
    %37 = arith.addf %34, %36 : vector<2x1xf32>
    %c0_20 = arith.constant 0 : index
    %c0_21 = arith.constant 0 : index
    %38 = vector.load %arg11[%c0_20, %c0_21] : memref<2x1xf32, #tpu.memory_space<vmem>>, vector<2x1xf32>
    tpu.vector_store %arg11[%c0_20, %c0_21], %37 {strides = array<i32>} : memref<2x1xf32, #tpu.memory_space<vmem>>, vector<2x1xf32>,
    %39 = arith.cmpf oeq, %21, %12 : vector<2x8xf32>
    %cst_22 = arith.constant 0.000000e+00 : f32
    %40 = vector.broadcast %cst_22 : f32 to vector<2x8xf32>
    %41 = arith.select %39, %5, %40 : vector<2x8xi1>, vector<2x8xf32>
    %c0_23 = arith.constant 0 : index
    %c0_24 = arith.constant 0 : index
    %42 = vector.load %arg12[%c0_23, %c0_24] : memref<2x1xf32, #tpu.memory_space<vmem>>, vector<2x1xf32>
    %cst_25 = arith.constant dense<0.000000e+00> : vector<2xf32>
    %43 = vector.multi_reduction <add>, %41, %cst_25 [1] : vector<2x8xf32> to vector<2xf32>
    %44 = vector.shape_cast %43 : vector<2xf32> to vector<2x1xf32>
    %45 = arith.addf %42, %44 : vector<2x1xf32>
    %c0_26 = arith.constant 0 : index
    %c0_27 = arith.constant 0 : index
    %46 = vector.load %arg12[%c0_26, %c0_27] : memref<2x1xf32, #tpu.memory_space<vmem>>, vector<2x1xf32>
    tpu.vector_store %arg12[%c0_26, %c0_27], %45 {strides = array<i32>} : memref<2x1xf32, #tpu.memory_space<vmem>>, vector<2x1xf32>,
    %c0_28 = arith.constant 0 : index
    %c0_29 = arith.constant 0 : index
    %47 = vector.load %arg14[%c0_28, %c0_29] : memref<2x1xf32, #tpu.memory_space<vmem>>, vector<2x1xf32>
    %cst_30 = arith.constant dense<0.000000e+00> : vector<2xf32>
    %48 = vector.multi_reduction <add>, %5, %cst_30 [1] : vector<2x8xf32> to vector<2xf32>
    %49 = vector.shape_cast %48 : vector<2xf32> to vector<2x1xf32>
    %50 = arith.addf %47, %49 : vector<2x1xf32>
    %c0_31 = arith.constant 0 : index
    %c0_32 = arith.constant 0 : index
    %51 = vector.load %arg14[%c0_31, %c0_32] : memref<2x1xf32, #tpu.memory_space<vmem>>, vector<2x1xf32>
    tpu.vector_store %arg14[%c0_31, %c0_32], %50 {strides = array<i32>} : memref<2x1xf32, #tpu.memory_space<vmem>>, vector<2x1xf32>,
    %52 = vector.extract_strided_slice %3 {offsets = [0, 0, 4], sizes = [2, 8, 1], strides = [1, 1, 1]} : vector<2x8x5xf32> to vector<2x8x1xf32>
    %53 = arith.cmpf olt, %52, %11 : vector<2x8x1xf32>
    %cst_33 = arith.constant 1.000000e+00 : f32
    %cst_34 = arith.constant 0.000000e+00 : f32
    %54 = vector.broadcast %cst_33 : f32 to vector<2x8x1xf32>
    %55 = vector.broadcast %cst_34 : f32 to vector<2x8x1xf32>
    %56 = arith.select %53, %54, %55 : vector<2x8x1xi1>, vector<2x8x1xf32>
    %c0_35 = arith.constant 0 : index
    %c0_36 = arith.constant 0 : index
    %57 = vector.load %arg13[%c0_35, %c0_36] : memref<2x1xf32, #tpu.memory_space<vmem>>, vector<2x1xf32>
    %cst_37 = arith.constant dense<0.000000e+00> : vector<2x1xf32>
    %58 = vector.multi_reduction <add>, %56, %cst_37 [1] : vector<2x8x1xf32> to vector<2x1xf32>
    %59 = arith.addf %57, %58 : vector<2x1xf32>
    %c0_38 = arith.constant 0 : index
    %c0_39 = arith.constant 0 : index
    %60 = vector.load %arg13[%c0_38, %c0_39] : memref<2x1xf32, #tpu.memory_space<vmem>>, vector<2x1xf32>
    tpu.vector_store %arg13[%c0_38, %c0_39], %59 {strides = array<i32>} : memref<2x1xf32, #tpu.memory_space<vmem>>, vector<2x1xf32>,
    %c0_i32_40 = arith.constant 0 : i32
    %61 = arith.cmpi eq, %arg0, %c0_i32_40 : i32
    %62 = arith.extui %61 : i1 to i32
    %c0_i32_41 = arith.constant 0 : i32
    %63 = arith.cmpi ne, %62, %c0_i32_41 : i32
    scf.if %63 {
      %c0_42 = arith.constant 0 : index
      %c0_43 = arith.constant 0 : index
      %64 = vector.load %arg10[%c0_42, %c0_43] : memref<2x1xf32, #tpu.memory_space<vmem>>, vector<2x1xf32>
      %65 = vector.shape_cast %64 : vector<2x1xf32> to vector<1x2x1xf32>
      %cst_44 = arith.constant dense<0.000000e+00> : vector<1xf32>
      %66 = vector.multi_reduction <add>, %65, %cst_44 [1, 2] : vector<1x2x1xf32> to vector<1xf32>
      %67 = vector.shape_cast %66 : vector<1xf32> to vector<1x1x1xf32>
      %68 = vector.extract %67[0, 0, 0] : f32 from vector<1x1x1xf32>
      %c0_45 = arith.constant 0 : index
      %c0_46 = arith.constant 0 : index
      %69 = vector.load %arg11[%c0_45, %c0_46] : memref<2x1xf32, #tpu.memory_space<vmem>>, vector<2x1xf32>
      %70 = vector.shape_cast %69 : vector<2x1xf32> to vector<1x2x1xf32>
      %cst_47 = arith.constant dense<0.000000e+00> : vector<1xf32>
      %71 = vector.multi_reduction <add>, %70, %cst_47 [1, 2] : vector<1x2x1xf32> to vector<1xf32>
      %72 = vector.shape_cast %71 : vector<1xf32> to vector<1x1x1xf32>
      %73 = vector.extract %72[0, 0, 0] : f32 from vector<1x1x1xf32>
      %74 = arith.divf %68, %73 : f32
      %c0_48 = arith.constant 0 : index
      %75 = memref.load %arg5[%c0_48] : memref<1xf32, #tpu.memory_space<smem>>
      memref.store %74, %arg5[%c0_48] : memref<1xf32, #tpu.memory_space<smem>>
      %c0_49 = arith.constant 0 : index
      %c0_50 = arith.constant 0 : index
      %76 = vector.load %arg12[%c0_49, %c0_50] : memref<2x1xf32, #tpu.memory_space<vmem>>, vector<2x1xf32>
      %77 = vector.shape_cast %76 : vector<2x1xf32> to vector<1x2x1xf32>
      %cst_51 = arith.constant dense<0.000000e+00> : vector<1xf32>
      %78 = vector.multi_reduction <add>, %77, %cst_51 [1, 2] : vector<1x2x1xf32> to vector<1xf32>
      %79 = vector.shape_cast %78 : vector<1xf32> to vector<1x1x1xf32>
      %80 = vector.extract %79[0, 0, 0] : f32 from vector<1x1x1xf32>
      %c0_52 = arith.constant 0 : index
      %c0_53 = arith.constant 0 : index
      %81 = vector.load %arg14[%c0_52, %c0_53] : memref<2x1xf32, #tpu.memory_space<vmem>>, vector<2x1xf32>
      %82 = vector.shape_cast %81 : vector<2x1xf32> to vector<1x2x1xf32>
      %cst_54 = arith.constant dense<0.000000e+00> : vector<1xf32>
      %83 = vector.multi_reduction <add>, %82, %cst_54 [1, 2] : vector<1x2x1xf32> to vector<1xf32>
      %84 = vector.shape_cast %83 : vector<1xf32> to vector<1x1x1xf32>
      %85 = vector.extract %84[0, 0, 0] : f32 from vector<1x1x1xf32>
      %86 = arith.divf %80, %85 : f32
      %cst_55 = arith.constant 1.000000e+02 : f32
      %87 = arith.mulf %cst_55, %86 : f32
      %cst_56 = arith.constant 1.000000e+02 : f32
      %88 = arith.subf %cst_56, %87 : f32
      %c0_57 = arith.constant 0 : index
      %89 = memref.load %arg6[%c0_57] : memref<1xf32, #tpu.memory_space<smem>>
      memref.store %88, %arg6[%c0_57] : memref<1xf32, #tpu.memory_space<smem>>
      %c0_58 = arith.constant 0 : index
      %c0_59 = arith.constant 0 : index
      %90 = vector.load %arg13[%c0_58, %c0_59] : memref<2x1xf32, #tpu.memory_space<vmem>>, vector<2x1xf32>
      %c0_60 = arith.constant 0 : index
      %c0_61 = arith.constant 0 : index
      %91 = vector.load %arg14[%c0_60, %c0_61] : memref<2x1xf32, #tpu.memory_space<vmem>>, vector<2x1xf32>
      %92 = arith.subf %90, %91 : vector<2x1xf32>
      %93 = math.absf %92 : vector<2x1xf32>
      %94 = vector.shape_cast %93 : vector<2x1xf32> to vector<1x2x1xf32>
      %cst_62 = arith.constant dense<0.000000e+00> : vector<1xf32>
      %95 = vector.multi_reduction <add>, %94, %cst_62 [1, 2] : vector<1x2x1xf32> to vector<1xf32>
      %96 = vector.shape_cast %95 : vector<1xf32> to vector<1x1x1xf32>
      %97 = vector.extract %96[0, 0, 0] : f32 from vector<1x1x1xf32>
      %cst_63 = arith.constant 5.000000e-01 : f32
      %98 = arith.mulf %97, %cst_63 : f32
      %c0_64 = arith.constant 0 : index
      %99 = memref.load %arg7[%c0_64] : memref<1xf32, #tpu.memory_space<smem>>
      memref.store %98, %arg7[%c0_64] : memref<1xf32, #tpu.memory_space<smem>>
    } else {
    }
    return
  }
  func.func @transform_0(%arg0: i32) -> (i32, i32, i32) {
    %c0_i32 = arith.constant 0 : i32
    %c0_i32_0 = arith.constant 0 : i32
    %c0_i32_1 = arith.constant 0 : i32
    return %c0_i32, %arg0, %c0_i32_0 : i32, i32, i32
  }
  func.func @transform_1(%arg0: i32) -> (i32, i32) {
    %c0_i32 = arith.constant 0 : i32
    %c0_i32_0 = arith.constant 0 : i32
    return %c0_i32, %arg0 : i32, i32
  }
  func.func @transform_2(%arg0: i32) -> (i32, i32) {
    %c0_i32 = arith.constant 0 : i32
    %c0_i32_0 = arith.constant 0 : i32
    return %c0_i32, %arg0 : i32, i32
  }
  func.func @transform_3(%arg0: i32) -> (i32, i32) {
    %c0_i32 = arith.constant 0 : i32
    %c0_i32_0 = arith.constant 0 : i32
    %c0_i32_1 = arith.constant 0 : i32
    return %c0_i32, %c0_i32_0 : i32, i32
  }
  func.func @transform_4(%arg0: i32) -> i32 {
    %c0_i32 = arith.constant 0 : i32
    %c0_i32_0 = arith.constant 0 : i32
    return %c0_i32 : i32
  }
  func.func @transform_5(%arg0: i32) -> i32 {
    %c0_i32 = arith.constant 0 : i32
    %c0_i32_0 = arith.constant 0 : i32
    return %c0_i32 : i32
  }
  func.func @transform_6(%arg0: i32) -> i32 {
    %c0_i32 = arith.constant 0 : i32
    %c0_i32_0 = arith.constant 0 : i32
    return %c0_i32 : i32
  }
  func.func @transform_7(%arg0: i32) -> i32 {
    %c0_i32 = arith.constant 0 : i32
    %c0_i32_0 = arith.constant 0 : i32
    return %c0_i32 : i32
  }
  func.func @transform_8(%arg0: i32) -> i32 {
    %c0_i32 = arith.constant 0 : i32
    %c0_i32_0 = arith.constant 0 : i32
    return %c0_i32 : i32
  }
}

</mosaic_0001>

<bundles_post_ra>
// kernel: tpu_custom_call.1
= control target key start
LH: loop header
LB: loop body
LE: loop exit
PB: predicated region body
PF: predicated region fallthrough
CT: control target
= control target key end

     0   :  { %14 = vsyncpa [#allocation8], 0  ;;  %s730_s0 = inlined_call_operand.vmem [shape: f32[2,8,5], index: 0, kind: input, shape index: {}]   ;;  %s731_s1 = inlined_call_operand.vmem [shape: s32[2,8], index: 1, kind: input, shape index: {}]   ;;  %s732_s2 = inlined_call_operand.vmem [shape: f32[2,8], index: 2, kind: input, shape index: {}]   ;;  %s733_s3 = inlined_call_operand.vmem [shape: f32[8,128], index: 3, kind: input, shape index: {}]   ;;  %s734_s4 = inlined_call_operand.hbm [shape: f32[1], index: 4, kind: output, shape index: {0}]   ;;  %s735_s5 = inlined_call_operand.hbm [shape: f32[1], index: 5, kind: output, shape index: {1}]   ;;  %s736_s6 = inlined_call_operand.hbm [shape: f32[1], index: 6, kind: output, shape index: {2}]   ;;  %s737_s7 = inlined_call_operand.hbm [shape: f32[1], index: 7, kind: output, shape index: {3}]   ;;  %s738_s8 = inlined_call_operand.hbm [shape: f32[1], index: 8, kind: output, shape index: {4}]  }
   0x1   :  { %15 = vsyncpa [#allocation10], 0  ;;  %v581_v0 = vld [vmem:[%s730_s0] sm:$0xff]  ;;  %vm141_vm0 = vcmask 39936   ;;  %v586_v1 = vld [vmem:[%s730_s0 + $0x8] sm:$0xff]  ;;  %v123_v2 = vlaneseq }
   0x2   :  { %v142_v3 = vsel %vm141_vm0, %v581_v0, -inf }
   0x3   :  { %16 = vsyncpa [#allocation13], 0  ;;  %143 = vmax.xlane.f32.xlu0 %v142_v3  ;;  %v590_v4 = vshrl.u32 %v123_v2, 7  ;;  %v145_v5 = vsel %vm141_vm0, %v586_v1, -inf  ;;  %v597_v6 = vld [vmem:[%s731_s1] sm:$0x3] }
   0x4   :  { %v124_v18 = vand.u32 127, %v123_v2  ;;  %v620_v28 = vld [vmem:[%s732_s2] sm:$0x3]  ;;  %v524_v30 = vmov 0   ;;  %vm176_vm5 = vcmp.eq.s32.totalorder %v597_v6, 4  ;;  %vm189_vm6 = vcmask 1041409  }
   0x5   :  { %v127_v7 = vsub.s32 0, %v590_v4  ;;  %v134_v8 = vsub.s32 1, %v590_v4  ;;  %450 = vset.pattern.permute.xlu1 %v524_v30  ;;  %451 = vset.pattern.permute.xlu0 %v524_v30  ;;  %v525_v51 = vmov 1.0   ;;  %vm193_vm7 = vcmask 58368   ;;  %v41_v58 = vld [vmem:[%s733_s3] sm:$0xff]  ;;  %s527_s3 = smov 124  }
   0x6   :  { %v183_v47 = vsub.s32 %v124_v18, %v590_v4  ;;  %v177_v52 = vsel %vm176_vm5, 0.1, %v525_v51  ;;  %vm29_vm8 = vcmask 1024   ;;  %v526_v57 = vmov 0.0   ;;  %s468_s20 = scalar_lea.hbm %s737_s7, 16 }
   0x7   :  { %146 = vmax.xlane.f32.xlu0 %v145_v5  ;;  %v128_v9 = vrot.slane %v597_v6, %v127_v7  ;;  %v135_v10 = vrot.slane %v597_v6, %v134_v8  ;;  %v212_v29 = vrot.slane %v620_v28, %v127_v7  ;;  %v219_v31 = vrot.slane %v620_v28, %v134_v8  ;;  %p469_p0 = scmp.ne.s32.totalorder %s737_s7, %s468_s20  ;;  %p472_p1 = scmp.lt.u32.totalorder %s468_s20, %s737_s7 }
   0x8   :  { %v201_v55 = vsel %vm193_vm7, %v177_v52, 0.0  ;;  %30 = vst.msk [vmem:[#allocation2] sm:$0x3] %vm29_vm8, %v526_v57  ;;  %31 = vst.msk [vmem:[#allocation3] sm:$0x3] %vm29_vm8, %v526_v57  ;;  %v61_v59 = vmul.f32 0.5, %v41_v58 }
   0x9   :  { %130 = vbcast.lane.b32.xlu1 %v128_v9, 256  ;;  %32 = vst.msk [vmem:[#allocation4] sm:$0x3] %vm29_vm8, %v526_v57  ;;  %33 = vst.msk [vmem:[#allocation5] sm:$0x3] %vm29_vm8, %v526_v57  ;;  %vm47_vm9 = vcmask 1043456   ;;  %p474_p2 = pnand %p472_p1, %p469_p0 }
   0xa   :  { %34 = vst.msk [vmem:[#allocation6] sm:$0x3] %vm29_vm8, %v526_v57  ;;  %v63_v60 = vrot.slane %v61_v59, 2  ;;  %vm105_vm10 = vcmask 1040384   ;;  %vm262_vm13 = vcmask 39968  }
   0xc   :  { %v65_v61 = vsub.f32 %v41_v58, %v63_v60  ;;  %v66_v62 = vadd.f32 %v63_v60, %v41_v58 }
   0xd   :  { %137 = vbcast.lane.b32.xlu1 %v135_v10, 256 }
   0xe   :  { %v73_v63 = vrot.slane %v66_v62, 4  ;;  %v77_v2 = vrot.slane %v65_v61, 4  ;;  %v67_v3 = vsub.f32 %v66_v62, %v65_v61 }
  0x10   :  { %v75_v4 = vmin.f32 %v66_v62, %v73_v63  ;;  %v79_v5 = vmax.f32 %v65_v61, %v77_v2  ;;  %v69_v6 = vrot.slane %v67_v3, 1  ;;  %v93_v10 = vmax.f32 %v66_v62, %v73_v63 }
  0x12   :  { %v80_v7 = vsub.f32 %v75_v4, %v79_v5  ;;  %v71_v8 = vmul.f32 %v69_v6, %v67_v3  ;;  %v251_v5 = vld [vmem:[#allocation6] sm:$0x3] }
  0x14   :  { %v81_v9 = vmax.f32 %v80_v7, 0.0 }
  0x7b   :  { %v131_v17 = vpop.permute.xlu1 %130 }
  0x7c   :  { %vm139_vm1 = vcmp.eq.s32.totalorder %v124_v18, %v131_v17 }
  0x7d   :  { %v166_v21 = vsel %vm139_vm1, %v581_v0, 0.0 }
  0x7e   :  { %v168_v23 = vsel %vm141_vm0, %v166_v21, 0.0 }
  0x7f   :  { %v138_v19 = vpop.permute.xlu1 %137 }
  0x80   :  { %vm140_vm2 = vcmp.eq.s32.totalorder %v124_v18, %v138_v19 }
  0x81   :  { %v167_v25 = vsel %vm140_vm2, %v586_v1, 0.0 }
  0x82   :  { %v171_v27 = vsel %vm141_vm0, %v167_v25, 0.0 }
  0x90   :  { %v603_v11 = vpop.xlane.xlu0 %143 }
  0x91   :  { %v148_v12 = vsub.f32 %v581_v0, %v603_v11  ;;  %vm257_vm12 = vcmp.lt.f32.partialorder %v581_v0, %v603_v11 }
  0x93   :  { %v150_v13 = vmul.f32 1.442695, %v148_v12  ;;  %v94_v12 = vmin.f32 %v65_v61, %v77_v2  ;;  %v227_v2 = vld [vmem:[#allocation4] sm:$0x3] }
  0x94   :  { %v607_v14 = vpop.xlane.xlu0 %146 }
  0x95   :  { %452 = vpow2.f32 %v150_v13  ;;  %v149_v15 = vsub.f32 %v586_v1, %v607_v14  ;;  %v83_v13 = vrot.slane %v81_v9, 1  ;;  %vm258_vm11 = vcmp.lt.f32.partialorder %v586_v1, %v607_v14 }
  0x97   :  { %v152_v16 = vmul.f32 1.442695, %v149_v15  ;;  %v87_v15 = vrot.slane %v71_v8, 4  ;;  %v85_v17 = vmul.f32 %v83_v13, %v81_v9 }
  0x99   :  { %454 = vpow2.f32 %v152_v16  ;;  %v95_v16 = vsub.f32 %v93_v10, %v94_v12  ;;  %v89_v18 = vadd.f32 %v87_v15, %v71_v8 }
  0x9b   :  { %v97_v19 = vrot.slane %v95_v16, 1 }
  0x9d   :  { %v99_v21 = vmul.f32 %v97_v19, %v95_v16 }
  0x9f   :  { %v453_v20 = vpop.eup %452 }
  0xa0   :  { %v154_v22 = vsel %vm141_vm0, %v453_v20, 0.0  ;;  %v90_v20 = vsub.f32 %v89_v18, %v85_v17 }
  0xa1   :  { %155 = vadd.xlane.f32.xlu0 %v154_v22 }
  0xa2   :  { %v100_v25 = vsub.f32 %v99_v21, %v90_v20 }
  0xa3   :  { %v455_v24 = vpop.eup %454 }
  0xa4   :  { %v157_v26 = vsel %vm141_vm0, %v455_v24, 0.0  ;;  %v43_v24 = vrot.slane %v41_v58, 4 }
  0xa5   :  { %169 = vadd.xlane.f32.xlu0 %v168_v23  ;;  %158 = vadd.xlane.f32.xlu1 %v157_v26 }
  0xa9   :  { %172 = vadd.xlane.f32.xlu0 %v171_v27 }
  0xbf   :  { %214 = vbcast.lane.b32.xlu0 %v212_v29, 256 }
  0xc3   :  { %221 = vbcast.lane.b32.xlu0 %v219_v31, 256  ;;  %v45_v31 = vsub.f32 %v41_v58, %v43_v24 }
 0x12e   :  { %v156_v32 = vpop.xlane.xlu0 %155 }
 0x132   :  { %v170_v33 = vpop.xlane.xlu0 %169  ;;  %v159_v35 = vpop.xlane.xlu1 %158 }
 0x133   :  { %456 = vlog2.f32 %v159_v35  ;;  %vm206_vm3 = vcmp.eq.f32.partialorder %v170_v33, %v603_v11 }
 0x134   :  { %458 = vlog2.f32 %v156_v32 }
 0x135   :  { %460 = vrcp.f32 %v90_v20 }
 0x136   :  { %v173_v34 = vpop.xlane.xlu0 %172  ;;  %462 = vrcp.f32 %v99_v21 }
 0x137   :  { %vm207_vm4 = vcmp.eq.f32.partialorder %v173_v34, %v607_v14 }
 0x13a   :  { %v215_v36 = vpop.permute.xlu0 %214 }
 0x13b   :  { %v225_v37 = vsel %vm206_vm3, %v215_v36, 0.0  ;;  %v252_v36 = vsel %vm193_vm7, %v620_v28, 0.0  ;;  %v200_v28 = vld [vmem:[#allocation3] sm:$0x3] }
 0x13c   :  { %231 = vperm.xlu1 %450, %v225_v37   ;;  %v46_v37 = vand.u32 2147483647, %v45_v31 }
 0x13d   :  { %v457_v40 = vpop.eup %456 }
 0x13e   :  { %v222_v38 = vpop.permute.xlu0 %221  ;;  %v459_v41 = vpop.eup %458  ;;  %v163_v42 = vmul.f32 0.6931472, %v457_v40 }
 0x13f   :  { %v226_v39 = vsel %vm207_vm4, %v222_v38, 0.0  ;;  %v161_v43 = vmul.f32 0.6931472, %v459_v41  ;;  %v461_v22 = vpop.eup %460 }
 0x140   :  { %234 = vperm.xlu0 %451, %v226_v39   ;;  %v165_v44 = vadd.f32 %v163_v42, %v607_v14  ;;  %v463_v26 = vpop.eup %462  ;;  %v92_v32 = vmul.f32 %v461_v22, %v85_v17  ;;  %v48_v39 = vsel %vm47_vm9, %v46_v37, 0.0  ;;  %v260_v42 = vsel %vm258_vm11, 1.0, %v526_v57 }
 0x141   :  { %v164_v45 = vadd.f32 %v161_v43, %v603_v11  ;;  %v178_v43 = vld [vmem:[#allocation2] sm:$0x3] }
 0x142   :  { %v175_v46 = vsub.f32 %v165_v44, %v173_v34  ;;  %v259_v44 = vsel %vm257_vm12, 1.0, %v526_v57 }
 0x143   :  { %v174_v48 = vsub.f32 %v164_v45, %v170_v33  ;;  %v102_v33 = vmul.f32 %v463_v26, %v100_v25 }
 0x144   :  { %v188_v49 = vrot.slane %v175_v46, %v183_v47  ;;  %v270_v46 = vsel %vm262_vm13, %v260_v42, 0.0 }
 0x145   :  { %v184_v50 = vrot.slane %v174_v48, %v183_v47  ;;  %v103_v38 = vsub.f32 %v92_v32, %v102_v33  ;;  %v271_v51 = vrot.slane %v270_v46, 4  ;;  %v261_v33 = vld [vmem:[#allocation5] sm:$0x3] }
 0x147   :  { %v190_v53 = vsel %vm189_vm6, %v188_v49, %v184_v50  ;;  %v104_v40 = vsub.f32 1.0, %v103_v38  ;;  %v263_v50 = vsel %vm262_vm13, %v259_v44, 0.0  ;;  %v272_v0 = vadd.f32 %v271_v51, %v270_v46 }
 0x148   :  { %v192_v54 = vmul.f32 %v190_v53, %v177_v52  ;;  %v264_v1 = vrot.slane %v263_v50, 4 }
 0x149   :  { %v106_v41 = vsel %vm105_vm10, %v104_v40, 0.0 }
 0x14a   :  { %v194_v56 = vsel %vm193_vm7, %v192_v54, 0.0  ;;  %v265_v11 = vadd.f32 %v264_v1, %v263_v50 }
 0x15f   :  { %195 = vadd.xlane.f32.xlu0 %v194_v56  ;;  %v266_v56 = vrot.slane %v265_v11, 2 }
 0x160   :  { %202 = vadd.xlane.f32.xlu1 %v201_v55  ;;  %v273_v55 = vrot.slane %v272_v0, 2 }
 0x161   :  { %v267_v58 = vadd.f32 %v266_v56, %v265_v11 }
 0x162   :  { %v274_v57 = vadd.f32 %v273_v55, %v272_v0 }
 0x163   :  { %v268_v60 = vrot.slane %v267_v58, 1 }
 0x164   :  { %v275_v59 = vrot.slane %v274_v57, 1 }
 0x165   :  { %v269_v62 = vadd.f32 %v268_v60, %v267_v58 }
 0x166   :  { %v276_v61 = vadd.f32 %v275_v59, %v274_v57 }
 0x168   :  { %v279_v63 = vsel %vm189_vm6, %v276_v61, %v269_v62 }
 0x1bb   :  { %v232_v23 = vpop.permute.xlu1 %231 }
 0x1bc   :  { %v239_v29 = vrot.slane %v232_v23, %v183_v47 }
 0x1bf   :  { %v235_v27 = vpop.permute.xlu0 %234 }
 0x1c0   :  { %v243_v30 = vrot.slane %v235_v27, %v183_v47 }
 0x1c2   :  { %v244_v34 = vsel %vm189_vm6, %v243_v30, %v239_v29 }
 0x1c3   :  { %v246_v35 = vsel %vm193_vm7, %v244_v34, 0.0 }
 0x1c4   :  { %247 = vadd.xlane.f32.xlu0 %v246_v35 }
 0x1c8   :  { %253 = vadd.xlane.f32.xlu0 %v252_v36 }
 0x1cc   :  { %49 = vadd.xlane.f32.xlu0 %v48_v39 }
 0x1d0   :  { %107 = vadd.xlane.f32.xlu0 %v106_v41 }
 0x1ec   :  { %v196_v45 = vpop.xlane.xlu0 %195 }
 0x1ed   :  { %v197_v47 = vadd.f32 %v196_v45, %v178_v43  ;;  %v203_v48 = vpop.xlane.xlu1 %202 }
 0x1ee   :  { %v204_v49 = vadd.f32 %v203_v48, %v200_v28 }
 0x1ef   :  { %199 = vst.msk [vmem:[#allocation2] sm:$0x3] %vm29_vm8, %v197_v47 }
 0x1f0   :  { %205 = vst.msk [vmem:[#allocation3] sm:$0x3] %vm29_vm8, %v204_v49 }
 0x1f6   :  { %v288_v14 = vld [vmem:[#allocation2] sm:$0x3] }
 0x1f7   :  { %v289_v52 = vsel %vm29_vm8, %v288_v14, 0.0  ;;  %v299_v53 = vld [vmem:[#allocation3] sm:$0x3] }
 0x1f8   :  { %290 = vadd.xlane.f32.xlu1 %v289_v52  ;;  %v300_v54 = vsel %vm29_vm8, %v299_v53, 0.0 }
 0x1f9   :  { %301 = vadd.xlane.f32.xlu0 %v300_v54 }
 0x209   :  { %280 = vrot.lane.b32.xlu1 %v279_v63, %s527_s3 }
 0x251   :  { %v248_v3 = vpop.xlane.xlu0 %247 }
 0x252   :  { %v249_v4 = vadd.f32 %v248_v3, %v227_v2 }
 0x254   :  { %250 = vst.msk [vmem:[#allocation4] sm:$0x3] %vm29_vm8, %v249_v4 }
 0x255   :  { %v254_v6 = vpop.xlane.xlu0 %253 }
 0x256   :  { %v255_v7 = vadd.f32 %v254_v6, %v251_v5 }
 0x258   :  { %256 = vst.msk [vmem:[#allocation6] sm:$0x3] %vm29_vm8, %v255_v7 }
 0x259   :  { %v50_v8 = vpop.xlane.xlu0 %49 }
 0x25a   :  { %v51_v9 = vrot.slane %v50_v8, 4 }
 0x25b   :  { %v316_v10 = vld [vmem:[#allocation4] sm:$0x3] }
 0x25c   :  { %v317_v12 = vsel %vm29_vm8, %v316_v10, 0.0  ;;  %v52_v13 = vadd.f32 %v51_v9, %v50_v8 }
 0x25d   :  { %318 = vadd.xlane.f32.xlu0 %v317_v12  ;;  %v108_v15 = vpop.xlane.xlu0 %107 }
 0x25e   :  { %v53_v16 = vrot.slane %v52_v13, 2  ;;  %v109_v17 = vrot.slane %v108_v15, 4 }
 0x25f   :  { %v327_v18 = vld [vmem:[#allocation6] sm:$0x3] }
 0x260   :  { %v328_v19 = vsel %vm29_vm8, %v327_v18, 0.0  ;;  %v110_v20 = vadd.f32 %v109_v17, %v108_v15  ;;  %v54_v21 = vadd.f32 %v53_v16, %v52_v13  ;;  %v347_v46 = vld [vmem:[#allocation6] sm:$0x3] }
 0x261   :  { %329 = vadd.xlane.f32.xlu0 %v328_v19 }
 0x262   :  { %v111_v22 = vrot.slane %v110_v20, 2  ;;  %v55_v23 = vrot.slane %v54_v21, 1 }
 0x264   :  { %v56_v24 = vadd.f32 %v55_v23, %v54_v21  ;;  %v112_v25 = vadd.f32 %v111_v22, %v110_v20 }
 0x266   :  { %422 = vpush %v56_v24  ;;  %v113_v26 = vrot.slane %v112_v25, 1 }
 0x268   :  { %v114_v27 = vadd.f32 %v113_v26, %v112_v25 }
 0x26a   :  { %424 = vpush %v114_v27 }
 0x285   :  { %v291_v29 = vpop.xlane.xlu1 %290 }
 0x286   :  { %v292_v30 = vrot.slane %v291_v29, 4  ;;  %v302_v31 = vpop.xlane.xlu0 %301 }
 0x287   :  { %v303_v32 = vrot.slane %v302_v31, 4 }
 0x288   :  { %v293_v34 = vadd.f32 %v292_v30, %v291_v29 }
 0x289   :  { %v304_v35 = vadd.f32 %v303_v32, %v302_v31  ;;  %v281_v36 = vpop.permute.xlu1 %280 }
 0x28a   :  { %v294_v37 = vrot.slane %v293_v34, 2  ;;  %v283_v38 = vadd.f32 %v281_v36, %v261_v33 }
 0x28b   :  { %v305_v39 = vrot.slane %v304_v35, 2 }
 0x28c   :  { %284 = vst.msk [vmem:[#allocation5] sm:$0x3] %vm29_vm8, %v283_v38  ;;  %v295_v40 = vadd.f32 %v294_v37, %v293_v34 }
 0x28d   :  { %v306_v41 = vadd.f32 %v305_v39, %v304_v35 }
 0x28e   :  { %v296_v42 = vrot.slane %v295_v40, 1 }
 0x28f   :  { %v307_v43 = vrot.slane %v306_v41, 1 }
 0x290   :  { %v297_v28 = vadd.f32 %v296_v42, %v295_v40 }
 0x291   :  { %v308_v44 = vadd.f32 %v307_v43, %v306_v41 }
 0x292   :  { %426 = vpush %v297_v28 }
 0x293   :  { %428 = vpush %v308_v44  ;;  %v346_v45 = vld [vmem:[#allocation5] sm:$0x3] }
 0x294   :  { %v348_v47 = vsub.f32 %v346_v45, %v347_v46 }
 0x296   :  { %v349_v48 = vand.u32 2147483647, %v348_v47 }
 0x297   :  { %s423_s12 = spop %422 }
 0x298   :  { %v350_v49 = vsel %vm29_vm8, %v349_v48, 0.0  ;;  %s58_s13 = smul.f32 0.2, %s423_s12 }
 0x299   :  { %351 = vadd.xlane.f32.xlu0 %v350_v49 }
 0x29a   :  { %60 = sst [smem:[#allocation12]] %s58_s13 }
 0x29b   :  { %s425_s14 = spop %424 }
 0x29c   :  { %s116_s15 = smul.f32 0.2, %s425_s14 }
 0x29e   :  { %118 = sst [smem:[#allocation14]] %s116_s15 }
 0x2c3   :  { %s667_s16 = spop %426 }
 0x2c4   :  { %s429_s17 = spop %428 }
 0x2c5   :  { %v310_v50 = vstv %s429_s17 }
 0x2c6   :  { %464 = vrcp.f32 %v310_v50 }
 0x2d0   :  { %v465_v51 = vpop.eup %464 }
 0x2d1   :  { %430 = vpush %v465_v51 }
 0x2ea   :  { %v319_v1 = vpop.xlane.xlu0 %318 }
 0x2eb   :  { %v320_v0 = vrot.slane %v319_v1, 4 }
 0x2ed   :  { %v321_v11 = vadd.f32 %v320_v0, %v319_v1 }
 0x2ee   :  { %v330_v14 = vpop.xlane.xlu0 %329 }
 0x2ef   :  { %v322_v52 = vrot.slane %v321_v11, 2  ;;  %v331_v53 = vrot.slane %v330_v14, 4 }
 0x2f1   :  { %v332_v54 = vadd.f32 %v331_v53, %v330_v14  ;;  %v323_v55 = vadd.f32 %v322_v52, %v321_v11 }
 0x2f3   :  { %v333_v56 = vrot.slane %v332_v54, 2  ;;  %v324_v57 = vrot.slane %v323_v55, 1 }
 0x2f4   :  { %477 = shalt.err (!%p474_p2)
}
 0x2f5   :  { %s528_s25 = smov [#allocation12]   ;;  %v325_v58 = vadd.f32 %v324_v57, %v323_v55  ;;  %v334_v59 = vadd.f32 %v333_v56, %v332_v54  ;;  %s478_s30 = scalar_lea.hbm %s738_s8, 16 }
 0x2f6   :  { %394 = dma.smem_to_hbm %s528_s25, 16, %s737_s7, [#allocation13]  }
 0x2f7   :  { %p479_p3 = scmp.ne.s32.totalorder %s738_s8, %s478_s30  ;;  %p482_p4 = scmp.lt.u32.totalorder %s478_s30, %s738_s8 }
 0x2f9   :  { %p484_p5 = pnand %p482_p4, %p479_p3 }
 0x2fb   :  { %487 = shalt.err (!%p484_p5)
}
 0x2fc   :  { %s529_s2 = smov [#allocation14]   ;;  %432 = vpush %v325_v58  ;;  %v335_v60 = vrot.slane %v334_v59, 1  ;;  %s488_s15 = scalar_lea.hbm %s734_s4, 16 }
 0x2fd   :  { %402 = dma.smem_to_hbm %s529_s2, 16, %s738_s8, [#allocation13]  }
 0x2fe   :  { %v336_v61 = vadd.f32 %v335_v60, %v334_v59  ;;  %p489_p6 = scmp.ne.s32.totalorder %s734_s4, %s488_s15  ;;  %p492_p7 = scmp.lt.u32.totalorder %s488_s15, %s734_s4 }
 0x300   :  { %434 = vpush %v336_v61  ;;  %p494_p8 = pnand %p492_p7, %p489_p6 }
 0x302   :  { %s431_s7 = spop %430 }
 0x303   :  { %s313_s12 = smul.f32 %s431_s7, %s667_s16 }
 0x305   :  { %315 = sst [smem:[#allocation7]] %s313_s12 }
 0x306   :  { %497 = shalt.err (!%p494_p8)
}
 0x307   :  { %s530_s8 = smov [#allocation7]   ;;  %s498_s9 = scalar_lea.hbm %s735_s5, 16 }
 0x308   :  { %370 = dma.smem_to_hbm %s530_s8, 16, %s734_s4, [#allocation8]  }
 0x309   :  { %p499_p9 = scmp.ne.s32.totalorder %s735_s5, %s498_s9  ;;  %p502_p10 = scmp.lt.u32.totalorder %s498_s9, %s735_s5 }
 0x30b   :  { %p504_p11 = pnand %p502_p10, %p499_p9 }
 0x326   :  { %v352_v62 = vpop.xlane.xlu0 %351 }
 0x327   :  { %v353_v63 = vrot.slane %v352_v62, 4 }
 0x329   :  { %v354_v2 = vadd.f32 %v353_v63, %v352_v62 }
 0x32b   :  { %v355_v3 = vrot.slane %v354_v2, 2 }
 0x32d   :  { %s433_s16 = spop %432  ;;  %v356_v5 = vadd.f32 %v355_v3, %v354_v2 }
 0x32f   :  { %v357_v6 = vrot.slane %v356_v5, 1 }
 0x331   :  { %s435_s23 = spop %434  ;;  %v358_v8 = vadd.f32 %v357_v6, %v356_v5 }
 0x332   :  { %v338_v4 = vstv %s435_s23 }
 0x333   :  { %466 = vrcp.f32 %v338_v4 }
 0x33d   :  { %v467_v7 = vpop.eup %466 }
 0x33e   :  { %436 = vpush %v467_v7 }
 0x33f   :  { %438 = vpush %v358_v8 }
 0x36f   :  { %s437_s24 = spop %436 }
 0x370   :  { %s341_s25 = smul.f32 %s437_s24, %s433_s16  ;;  %s439_s26 = spop %438 }
 0x371   :  { %s360_s27 = smul.f32 0.5, %s439_s26 }
 0x372   :  { %s342_s28 = smul.f32 100.0, %s341_s25 }
 0x373   :  { %362 = sst [smem:[#allocation11]] %s360_s27 }
 0x374   :  { %s343_s4 = ssub.f32 100.0, %s342_s28 }
 0x376   :  { %345 = sst [smem:[#allocation9]] %s343_s4 }
 0x377   :  { %507 = shalt.err (!%p504_p11)
}
 0x378   :  { %s531_s11 = smov [#allocation9]   ;;  %s508_s14 = scalar_lea.hbm %s736_s6, 16 }
 0x379   :  { %378 = dma.smem_to_hbm %s531_s11, 16, %s735_s5, [#allocation10]  }
 0x37a   :  { %p509_p12 = scmp.ne.s32.totalorder %s736_s6, %s508_s14  ;;  %p512_p13 = scmp.lt.u32.totalorder %s508_s14, %s736_s6 }
 0x37c   :  { %p514_p0 = pnand %p512_p13, %p509_p12 }
 0x37e   :  { %517 = shalt.err (!%p514_p0)
}
 0x37f   :  { %s532_s20 = smov [#allocation11]  }
 0x380   :  { %386 = dma.smem_to_hbm %s532_s20, 16, %s736_s6, [#allocation10]  }
 0x381   :  { %518 = dma.done.wait [#allocation8], 16  }
 0x382   :  { %519 = vsyncadd [#allocation8], 4294967280 }
 0x383   :  { %520 = dma.done.wait [#allocation10], 32  }
 0x384   :  { %521 = vsyncadd [#allocation10], 4294967264 }
 0x385   :  { %522 = dma.done.wait [#allocation13], 32  }
 0x386   :  { %523 = vsyncadd [#allocation13], 4294967264 }
 0x387   :  { %418 = sfence }
 0x388   :  { %419 = vsyncpa [#allocation8], 1 }
 0x389   :  { %420 = vsyncpa [#allocation10], 1 }
 0x38a   :  { %421 = vsyncpa [#allocation13], 1 }

</bundles_post_ra>
